<compile_context>
chip_gen: v7x
topology: tpu7x:2x2x1
jax: 0.10.0
libtpu: 0.0.40
codegen_flags: <defaults>
</compile_context>

<pallas_src>
import functools

import jax
import jax.numpy as jnp
from jax.experimental import pallas as pl
from jax.experimental.pallas import tpu as pltpu


# ---------------------------------------------------------------------------
# In-kernel helpers (all shapes static Python ints).
# ---------------------------------------------------------------------------

def _split_heads(x2, bt, seq, num_heads, head_size):
    """(bt*seq, num_heads*head_size) -> (bt*num_heads, seq, head_size)."""
    parts = [x2[b * seq:(b + 1) * seq, h * head_size:(h + 1) * head_size]
             for b in range(bt) for h in range(num_heads)]
    return jnp.stack(parts, axis=0)


def _merge_heads(o3, bt, seq, num_heads, head_size):
    """(bt*num_heads, seq, head_size) -> (bt*seq, num_heads*head_size)."""
    rows = [jnp.concatenate([o3[b * num_heads + h] for h in range(num_heads)],
                            axis=-1)
            for b in range(bt)]
    return rows[0] if bt == 1 else jnp.concatenate(rows, axis=0)


def _attention_core(q2, k2, v2, *, bt, q_len, k_len, num_heads, head_size):
    """Scaled-dot-product attention on a (bt * seq, E) token slab.

    The softmax scale (1/sqrt(size_emb)) is already folded into Wq on the host,
    so q2 arrives pre-scaled.
    """
    q3 = _split_heads(q2, bt, q_len, num_heads, head_size)   # (bt*H, Lq, hs)
    k3 = _split_heads(k2, bt, k_len, num_heads, head_size)   # (bt*H, Lk, hs)
    v3 = _split_heads(v2, bt, k_len, num_heads, head_size)   # (bt*H, Lk, hs)

    # Heads-batched score matmul (leading batch dim -> batched MXU op).
    s = jnp.einsum('bqd,bkd->bqk', q3, k3, preferred_element_type=jnp.float32)
    m = jnp.max(s, axis=-1, keepdims=True)
    p = jnp.exp(s - m)
    denom = jnp.sum(p, axis=-1, keepdims=True)
    p = p * pl.reciprocal(denom, approx=True)                 # EUP slot

    o3 = jnp.einsum('bqk,bkd->bqd', p.astype(v3.dtype), v3,
                    preferred_element_type=jnp.float32)       # (bt*H, Lq, hs)
    return _merge_heads(o3, bt, q_len, num_heads, head_size)  # (bt*Lq, E)


# ---------------------------------------------------------------------------
# Kernels.
# ---------------------------------------------------------------------------

def _mhsa_fused_kernel(x_ref, wqkv_ref, wo_ref, bo_ref, o_ref, *,
                       bt, seq, num_heads, head_size):
    """Self-attention fast path (Q == K == V): one fused QKV GEMM per step."""
    E = num_heads * head_size
    # (bt*seq, E) @ (E, 3E): all three projections in a single MXU GEMM.
    qkv = jnp.dot(x_ref[...], wqkv_ref[...], preferred_element_type=jnp.float32)
    q2 = qkv[:, 0 * E:1 * E]
    k2 = qkv[:, 1 * E:2 * E]
    v2 = qkv[:, 2 * E:3 * E]
    att = _attention_core(q2, k2, v2, bt=bt, q_len=seq, k_len=seq,
                          num_heads=num_heads, head_size=head_size)
    out = jnp.dot(att, wo_ref[...], preferred_element_type=jnp.float32) + bo_ref[...]
    o_ref[...] = out.astype(o_ref.dtype)


def _mha_kernel(q_ref, k_ref, v_ref, wq_ref, wk_ref, wv_ref, wo_ref, bo_ref,
                o_ref, *, bt, q_len, k_len, num_heads, head_size):
    """General path (distinct Q / K / V inputs); weights pre-transposed."""
    q2 = jnp.dot(q_ref[...], wq_ref[...], preferred_element_type=jnp.float32)
    k2 = jnp.dot(k_ref[...], wk_ref[...], preferred_element_type=jnp.float32)
    v2 = jnp.dot(v_ref[...], wv_ref[...], preferred_element_type=jnp.float32)
    att = _attention_core(q2, k2, v2, bt=bt, q_len=q_len, k_len=k_len,
                          num_heads=num_heads, head_size=head_size)
    out = jnp.dot(att, wo_ref[...], preferred_element_type=jnp.float32) + bo_ref[...]
    o_ref[...] = out.astype(o_ref.dtype)


# ---------------------------------------------------------------------------
# Wrapper.
# ---------------------------------------------------------------------------

def _pick_batch_tile(n, *seq_lens):
    """Batch elements per grid step.

    Keep >= 2 grid steps when n >= 2 (both v7x TensorCores get work), keep each
    step's token slab reasonably tall (amortizes ~0.35us/step overhead), and
    keep every block's sublane dim a multiple of 8.
    """
    target_rows = 256
    cap = max(1, target_rows // max(1, max(seq_lens)))
    if n >= 2:
        cap = max(1, min(cap, n // 2))
    best = None
    for d in range(1, min(n, cap) + 1):
        if n % d == 0 and all((d * s) % 8 == 0 for s in seq_lens):
            best = d
    if best is None:
        best = n  # one grid step; blocks equal the full (flattened) arrays
    return best


def multi_head_self_attention(Q, K, V, params, *, num_heads, batch_tile=None):
    """Pallas forward of MultiHeadSelfAttention. Q, K, V: (n, seq, size_emb).

    If Q, K, V are the same array (self-attention), a fused-QKV kernel is used;
    otherwise a general kernel with separate (pre-transposed) projections runs.
    """
    wq, wk, wv, wo, bo = params
    n, q_len, E = Q.shape
    k_len = K.shape[1]
    assert E % num_heads == 0
    assert K.shape[0] == n and V.shape[0] == n and V.shape[1] == k_len
    head_size = E // num_heads
    scale = 1.0 / (float(E) ** 0.5)   # module divides by sqrt(size_emb)

    # Host-side weight prep: (out, in) -> (in, out), fold softmax scale into Wq.
    wq_t = (wq * scale).T
    wk_t = wk.T
    wv_t = wv.T
    wo_t = wo.T
    bo2 = bo.reshape(1, E)

    bt = batch_tile if batch_tile is not None else _pick_batch_tile(n, q_len, k_len)
    assert n % bt == 0
    grid = (n // bt,)
    cparams = pltpu.CompilerParams(dimension_semantics=("parallel",))

    self_attn = (Q is K) and (K is V)

    if self_attn:
        wqkv_t = jnp.concatenate([wq_t, wk_t, wv_t], axis=1)      # (E, 3E)
        x2 = Q.reshape(n * q_len, E)                               # token slab
        kernel = functools.partial(_mhsa_fused_kernel, bt=bt, seq=q_len,
                                   num_heads=num_heads, head_size=head_size)
        out2 = pl.pallas_call(
            kernel,
            out_shape=jax.ShapeDtypeStruct((n * q_len, E), Q.dtype),
            grid_spec=pltpu.PrefetchScalarGridSpec(
                num_scalar_prefetch=0,
                grid=grid,
                in_specs=[
                    pl.BlockSpec((bt * q_len, E), lambda i: (i, 0)),
                    pl.BlockSpec((E, 3 * E), lambda i: (0, 0)),
                    pl.BlockSpec((E, E), lambda i: (0, 0)),
                    pl.BlockSpec((1, E), lambda i: (0, 0)),
                ],
                out_specs=pl.BlockSpec((bt * q_len, E), lambda i: (i, 0)),
            ),
            compiler_params=cparams,
        )(x2, wqkv_t, wo_t, bo2)
    else:
        q2 = Q.reshape(n * q_len, E)
        k2 = K.reshape(n * k_len, E)
        v2 = V.reshape(n * k_len, E)
        kernel = functools.partial(_mha_kernel, bt=bt, q_len=q_len, k_len=k_len,
                                   num_heads=num_heads, head_size=head_size)
        w_spec = pl.BlockSpec((E, E), lambda i: (0, 0))
        out2 = pl.pallas_call(
            kernel,
            out_shape=jax.ShapeDtypeStruct((n * q_len, E), Q.dtype),
            grid_spec=pltpu.PrefetchScalarGridSpec(
                num_scalar_prefetch=0,
                grid=grid,
                in_specs=[
                    pl.BlockSpec((bt * q_len, E), lambda i: (i, 0)),
                    pl.BlockSpec((bt * k_len, E), lambda i: (i, 0)),
                    pl.BlockSpec((bt * k_len, E), lambda i: (i, 0)),
                    w_spec, w_spec, w_spec, w_spec,
                    pl.BlockSpec((1, E), lambda i: (0, 0)),
                ],
                out_specs=pl.BlockSpec((bt * q_len, E), lambda i: (i, 0)),
            ),
            compiler_params=cparams,
        )(q2, k2, v2, wq_t, wk_t, wv_t, wo_t, bo2)

    return out2.reshape(n, q_len, E)


# ---------------------------------------------------------------------------
# Pure-JAX reference (replicates the PyTorch forward with mask=None).
# ---------------------------------------------------------------------------

def _reference(Q, K, V, params, *, num_heads):
    wq, wk, wv, wo, bo = params
    n, q_len, e = Q.shape
    hs = e // num_heads
    q = (Q @ wq.T).reshape(n, q_len, num_heads, hs)
    k = (K @ wk.T).reshape(n, K.shape[1], num_heads, hs)
    v = (V @ wv.T).reshape(n, V.shape[1], num_heads, hs)
    qk = jnp.einsum('nQhs,nKhs->nhQK', q, k)
    s = jax.nn.softmax(qk / (e ** 0.5), axis=3)
    att = jnp.einsum('nhQK,nKhs->nQhs', s, v).reshape(n, q_len, e)
    return att @ wo.T + bo


if __name__ == "__main__":
    # Small shapes: batch=2, seq=8, size_emb=32, num_heads=4 (head_size=8)
    n, seq, size_emb, num_heads = 2, 8, 32, 4

    key = jax.random.PRNGKey(0)
    ks = jax.random.split(key, 8)

    init = 1.0 / (size_emb ** 0.5)
    wq = jax.random.uniform(ks[3], (size_emb, size_emb), jnp.float32, -init, init)
    wk = jax.random.uniform(ks[4], (size_emb, size_emb), jnp.float32, -init, init)
    wv = jax.random.uniform(ks[5], (size_emb, size_emb), jnp.float32, -init, init)
    wo = jax.random.uniform(ks[6], (size_emb, size_emb), jnp.float32, -init, init)
    bo = jax.random.uniform(ks[7], (size_emb,), jnp.float32, -init, init)
    params = (wq, wk, wv, wo, bo)

    # --- Self-attention path (Q is K is V): fused-QKV kernel --------------
    x = jax.random.normal(ks[0], (n, seq, size_emb), jnp.float32)
    out_self = multi_head_self_attention(x, x, x, params, num_heads=num_heads)
    out_self = jax.block_until_ready(out_self)
    ref_self = _reference(x, x, x, params, num_heads=num_heads)
    assert out_self.shape == (n, seq, size_emb)
    assert jnp.allclose(out_self, ref_self, atol=2e-3, rtol=2e-3), \
        "self-attention path mismatch vs reference"

    # --- General path (distinct Q, K, V): separate-projection kernel ------
    Q = jax.random.normal(ks[0], (n, seq, size_emb), jnp.float32)
    K = jax.random.normal(ks[1], (n, seq, size_emb), jnp.float32)
    V = jax.random.normal(ks[2], (n, seq, size_emb), jnp.float32)
    out_x = multi_head_self_attention(Q, K, V, params, num_heads=num_heads)
    out_x = jax.block_until_ready(out_x)
    ref_x = _reference(Q, K, V, params, num_heads=num_heads)
    assert jnp.allclose(out_x, ref_x, atol=2e-3, rtol=2e-3), \
        "general path mismatch vs reference"

    print("KERNEL_OK")
</pallas_src>

<mosaic_0001>
module attributes {stable_mosaic.version = 11 : i64} {
  func.func @_mhsa_fused_kernel(%arg0: i32, %arg1: memref<8x32xf32, #tpu.memory_space<vmem>>, %arg2: memref<32x96xf32, #tpu.memory_space<vmem>>, %arg3: memref<32x32xf32, #tpu.memory_space<vmem>>, %arg4: memref<1x32xf32, #tpu.memory_space<vmem>>, %arg5: memref<8x32xf32, #tpu.memory_space<vmem>>) attributes {dimension_semantics = [#tpu.dimension_semantics<parallel>], iteration_bounds = array<i64: 2>, scalar_prefetch = 0 : i64, scratch_operands = 0 : i64, tpu.core_type = #tpu.core_type<tc>, window_params = [{transform_indices = @transform_0, window_bounds = array<i64: 8, 32>}, {pipeline_mode = #tpu.pipeline_mode<synchronous>, transform_indices = @transform_1, window_bounds = array<i64: 32, 96>}, {pipeline_mode = #tpu.pipeline_mode<synchronous>, transform_indices = @transform_2, window_bounds = array<i64: 32, 32>}, {pipeline_mode = #tpu.pipeline_mode<synchronous>, transform_indices = @transform_3, window_bounds = array<i64: 1, 32>}, {transform_indices = @transform_4, window_bounds = array<i64: 8, 32>}]} {
    %c0 = arith.constant 0 : index
    %c0_0 = arith.constant 0 : index
    %0 = vector.load %arg1[%c0, %c0_0] : memref<8x32xf32, #tpu.memory_space<vmem>>, vector<8x32xf32>
    %c0_1 = arith.constant 0 : index
    %c0_2 = arith.constant 0 : index
    %1 = vector.load %arg2[%c0_1, %c0_2] : memref<32x96xf32, #tpu.memory_space<vmem>>, vector<32x96xf32>
    %cst = arith.constant dense<0.000000e+00> : vector<8x96xf32>
    %2 = tpu.matmul %0, %1, %cst {dimension_numbers = #tpu.dot_dimension_numbers<[1], [0], [0], [1], [0, 0, 1, 1], [], []>} : vector<8x32xf32>, vector<32x96xf32>, vector<8x96xf32> -> vector<8x96xf32>
    %3 = vector.extract_strided_slice %2 {offsets = [0, 0], sizes = [8, 32], strides = [1, 1]} : vector<8x96xf32> to vector<8x32xf32>
    %4 = vector.extract_strided_slice %2 {offsets = [0, 32], sizes = [8, 32], strides = [1, 1]} : vector<8x96xf32> to vector<8x32xf32>
    %5 = vector.extract_strided_slice %2 {offsets = [0, 64], sizes = [8, 32], strides = [1, 1]} : vector<8x96xf32> to vector<8x32xf32>
    %6 = vector.extract_strided_slice %3 {offsets = [0, 0], sizes = [8, 8], strides = [1, 1]} : vector<8x32xf32> to vector<8x8xf32>
    %7 = vector.extract_strided_slice %3 {offsets = [0, 8], sizes = [8, 8], strides = [1, 1]} : vector<8x32xf32> to vector<8x8xf32>
    %8 = vector.extract_strided_slice %3 {offsets = [0, 16], sizes = [8, 8], strides = [1, 1]} : vector<8x32xf32> to vector<8x8xf32>
    %9 = vector.extract_strided_slice %3 {offsets = [0, 24], sizes = [8, 8], strides = [1, 1]} : vector<8x32xf32> to vector<8x8xf32>
    %10 = vector.shape_cast %6 : vector<8x8xf32> to vector<1x8x8xf32>
    %11 = vector.shape_cast %7 : vector<8x8xf32> to vector<1x8x8xf32>
    %12 = vector.shape_cast %8 : vector<8x8xf32> to vector<1x8x8xf32>
    %13 = vector.shape_cast %9 : vector<8x8xf32> to vector<1x8x8xf32>
    %14 = tpu.concatenate %10, %11, %12, %13 in 0 : vector<1x8x8xf32>, vector<1x8x8xf32>, vector<1x8x8xf32>, vector<1x8x8xf32> -> vector<4x8x8xf32>
    %15 = vector.extract_strided_slice %4 {offsets = [0, 0], sizes = [8, 8], strides = [1, 1]} : vector<8x32xf32> to vector<8x8xf32>
    %16 = vector.extract_strided_slice %4 {offsets = [0, 8], sizes = [8, 8], strides = [1, 1]} : vector<8x32xf32> to vector<8x8xf32>
    %17 = vector.extract_strided_slice %4 {offsets = [0, 16], sizes = [8, 8], strides = [1, 1]} : vector<8x32xf32> to vector<8x8xf32>
    %18 = vector.extract_strided_slice %4 {offsets = [0, 24], sizes = [8, 8], strides = [1, 1]} : vector<8x32xf32> to vector<8x8xf32>
    %19 = vector.shape_cast %15 : vector<8x8xf32> to vector<1x8x8xf32>
    %20 = vector.shape_cast %16 : vector<8x8xf32> to vector<1x8x8xf32>
    %21 = vector.shape_cast %17 : vector<8x8xf32> to vector<1x8x8xf32>
    %22 = vector.shape_cast %18 : vector<8x8xf32> to vector<1x8x8xf32>
    %23 = tpu.concatenate %19, %20, %21, %22 in 0 : vector<1x8x8xf32>, vector<1x8x8xf32>, vector<1x8x8xf32>, vector<1x8x8xf32> -> vector<4x8x8xf32>
    %24 = vector.extract_strided_slice %5 {offsets = [0, 0], sizes = [8, 8], strides = [1, 1]} : vector<8x32xf32> to vector<8x8xf32>
    %25 = vector.extract_strided_slice %5 {offsets = [0, 8], sizes = [8, 8], strides = [1, 1]} : vector<8x32xf32> to vector<8x8xf32>
    %26 = vector.extract_strided_slice %5 {offsets = [0, 16], sizes = [8, 8], strides = [1, 1]} : vector<8x32xf32> to vector<8x8xf32>
    %27 = vector.extract_strided_slice %5 {offsets = [0, 24], sizes = [8, 8], strides = [1, 1]} : vector<8x32xf32> to vector<8x8xf32>
    %28 = vector.shape_cast %24 : vector<8x8xf32> to vector<1x8x8xf32>
    %29 = vector.shape_cast %25 : vector<8x8xf32> to vector<1x8x8xf32>
    %30 = vector.shape_cast %26 : vector<8x8xf32> to vector<1x8x8xf32>
    %31 = vector.shape_cast %27 : vector<8x8xf32> to vector<1x8x8xf32>
    %32 = tpu.concatenate %28, %29, %30, %31 in 0 : vector<1x8x8xf32>, vector<1x8x8xf32>, vector<1x8x8xf32>, vector<1x8x8xf32> -> vector<4x8x8xf32>
    "tpu.trace_start"() <{level = 10 : i32, message = "bqd,bkd->bqk"}> : () -> ()
    %cst_3 = arith.constant dense<0.000000e+00> : vector<4x8x8xf32>
    %33 = tpu.matmul %14, %23, %cst_3 {dimension_numbers = #tpu.dot_dimension_numbers<[2], [2], [1], [1], [0, 0, 0, 1, 1, 1], [0], [0]>} : vector<4x8x8xf32>, vector<4x8x8xf32>, vector<4x8x8xf32> -> vector<4x8x8xf32>
    "tpu.trace_stop"() : () -> ()
    %cst_4 = arith.constant dense<0xFF800000> : vector<4x8xf32>
    %34 = vector.multi_reduction <maximumf>, %33, %cst_4 [2] : vector<4x8x8xf32> to vector<4x8xf32>
    %35 = vector.shape_cast %34 : vector<4x8xf32> to vector<4x8x1xf32>
    %36 = vector.broadcast %35 : vector<4x8x1xf32> to vector<4x8x8xf32>
    %37 = arith.subf %33, %36 : vector<4x8x8xf32>
    %38 = math.exp %37 : vector<4x8x8xf32>
    %cst_5 = arith.constant dense<0.000000e+00> : vector<4x8xf32>
    %39 = vector.multi_reduction <add>, %38, %cst_5 [2] : vector<4x8x8xf32> to vector<4x8xf32>
    %40 = vector.shape_cast %39 : vector<4x8xf32> to vector<4x8x1xf32>
    %41 = tpu.reciprocal %40 {approx = true} : vector<4x8x1xf32> -> vector<4x8x1xf32>
    %42 = vector.broadcast %41 : vector<4x8x1xf32> to vector<4x8x8xf32>
    %43 = arith.mulf %38, %42 : vector<4x8x8xf32>
    "tpu.trace_start"() <{level = 10 : i32, message = "bqk,bkd->bqd"}> : () -> ()
    %cst_6 = arith.constant dense<0.000000e+00> : vector<4x8x8xf32>
    %44 = tpu.matmul %43, %32, %cst_6 {dimension_numbers = #tpu.dot_dimension_numbers<[2], [1], [1], [2], [0, 0, 0, 1, 1, 2], [0], [0]>} : vector<4x8x8xf32>, vector<4x8x8xf32>, vector<4x8x8xf32> -> vector<4x8x8xf32>
    "tpu.trace_stop"() : () -> ()
    %45 = vector.extract_strided_slice %44 {offsets = [0, 0, 0], sizes = [1, 8, 8], strides = [1, 1, 1]} : vector<4x8x8xf32> to vector<1x8x8xf32>
    %46 = vector.shape_cast %45 : vector<1x8x8xf32> to vector<8x8xf32>
    %47 = vector.extract_strided_slice %44 {offsets = [1, 0, 0], sizes = [1, 8, 8], strides = [1, 1, 1]} : vector<4x8x8xf32> to vector<1x8x8xf32>
    %48 = vector.shape_cast %47 : vector<1x8x8xf32> to vector<8x8xf32>
    %49 = vector.extract_strided_slice %44 {offsets = [2, 0, 0], sizes = [1, 8, 8], strides = [1, 1, 1]} : vector<4x8x8xf32> to vector<1x8x8xf32>
    %50 = vector.shape_cast %49 : vector<1x8x8xf32> to vector<8x8xf32>
    %51 = vector.extract_strided_slice %44 {offsets = [3, 0, 0], sizes = [1, 8, 8], strides = [1, 1, 1]} : vector<4x8x8xf32> to vector<1x8x8xf32>
    %52 = vector.shape_cast %51 : vector<1x8x8xf32> to vector<8x8xf32>
    %53 = tpu.concatenate %46, %48, %50, %52 in 1 : vector<8x8xf32>, vector<8x8xf32>, vector<8x8xf32>, vector<8x8xf32> -> vector<8x32xf32>
    %c0_7 = arith.constant 0 : index
    %c0_8 = arith.constant 0 : index
    %54 = vector.load %arg3[%c0_7, %c0_8] : memref<32x32xf32, #tpu.memory_space<vmem>>, vector<32x32xf32>
    %cst_9 = arith.constant dense<0.000000e+00> : vector<8x32xf32>
    %55 = tpu.matmul %53, %54, %cst_9 {dimension_numbers = #tpu.dot_dimension_numbers<[1], [0], [0], [1], [0, 0, 1, 1], [], []>} : vector<8x32xf32>, vector<32x32xf32>, vector<8x32xf32> -> vector<8x32xf32>
    %c0_10 = arith.constant 0 : index
    %c0_11 = arith.constant 0 : index
    %56 = vector.load %arg4[%c0_10, %c0_11] : memref<1x32xf32, #tpu.memory_space<vmem>>, vector<1x32xf32>
    %57 = vector.broadcast %56 : vector<1x32xf32> to vector<8x32xf32>
    %58 = arith.addf %55, %57 : vector<8x32xf32>
    %c0_12 = arith.constant 0 : index
    %c0_13 = arith.constant 0 : index
    %59 = vector.load %arg5[%c0_12, %c0_13] : memref<8x32xf32, #tpu.memory_space<vmem>>, vector<8x32xf32>
    tpu.vector_store %arg5[%c0_12, %c0_13], %58 {strides = array<i32>} : memref<8x32xf32, #tpu.memory_space<vmem>>, vector<8x32xf32>,
    return
  }
  func.func @transform_0(%arg0: i32) -> (i32, i32) {
    %c0_i32 = arith.constant 0 : i32
    %c0_i32_0 = arith.constant 0 : i32
    return %arg0, %c0_i32 : i32, i32
  }
  func.func @transform_1(%arg0: i32) -> (i32, i32) {
    %c0_i32 = arith.constant 0 : i32
    %c0_i32_0 = arith.constant 0 : i32
    %c0_i32_1 = arith.constant 0 : i32
    return %c0_i32, %c0_i32_0 : i32, i32
  }
  func.func @transform_2(%arg0: i32) -> (i32, i32) {
    %c0_i32 = arith.constant 0 : i32
    %c0_i32_0 = arith.constant 0 : i32
    %c0_i32_1 = arith.constant 0 : i32
    return %c0_i32, %c0_i32_0 : i32, i32
  }
  func.func @transform_3(%arg0: i32) -> (i32, i32) {
    %c0_i32 = arith.constant 0 : i32
    %c0_i32_0 = arith.constant 0 : i32
    %c0_i32_1 = arith.constant 0 : i32
    return %c0_i32, %c0_i32_0 : i32, i32
  }
  func.func @transform_4(%arg0: i32) -> (i32, i32) {
    %c0_i32 = arith.constant 0 : i32
    %c0_i32_0 = arith.constant 0 : i32
    return %arg0, %c0_i32 : i32, i32
  }
}

</mosaic_0001>

<bundles_post_ra>
// kernel: tpu_custom_call.1
= control target key start
LH: loop header
LB: loop body
LE: loop exit
PB: predicated region body
PF: predicated region fallthrough
CT: control target
= control target key end

     0   :  { %9 = vsyncpa [#allocation3], 0  ;;  %s1919_s0 = inlined_call_operand.hbm [shape: f32[16,32], index: 0, kind: input, shape index: {}]   ;;  %s1920_s1 = inlined_call_operand.hbm [shape: f32[32,96], index: 1, kind: input, shape index: {}]   ;;  %s1921_s2 = inlined_call_operand.hbm [shape: f32[32,32], index: 2, kind: input, shape index: {}]   ;;  %s1922_s3 = inlined_call_operand.vmem [shape: f32[1,32], index: 3, kind: input, shape index: {}]   ;;  %s1923_s4 = inlined_call_operand.hbm [shape: f32[16,32], index: 4, kind: output, shape index: {}]  }
   0x1   :  { %11 = vsyncpa [#allocation3 + $0x1], 0 }
   0x2   :  { %12 = vsyncpa [#allocation6], 0 }
   0x3   :  { %13 = vsyncpa [#allocation4], 0 }
   0x4   :  { %15 = vsyncpa [#allocation4 + $0x1], 0  ;;  %s1613_s15 = smov 0   ;;  %s1615_s16 = smov 0  }
   0x5   :  { %s1617_s17 = smov 0   ;;  %s1619_s18 = smov 0  }
   0x6 LB: > { %s1634_s19 = sadd.s32 4294967295, %s1569_s18   ;;  %s1186_s20 = sadd.s32 4294967294, %s1569_s18   ;;  %s1569_s18 = sphi %s1619_s18, %s1943_s18   ;;  %s1565_s17 = sphi %s1617_s17, %s1942_s17   ;;  %s1561_s16 = sphi %s1615_s16, %s1941_s16   ;;  %s1557_s15 = sphi %s1613_s15, %s1940_s15  }
   0x7   : > { %p41_p0 = scmp.ne.s32.totalorder %s1561_s16, %s1557_s15  ;;  %p1924_p1 = scmp.eq.s32.totalorder %s1634_s19, 0 }
   0x8   : > { %p134_p3 = scmp.eq.s32.totalorder %s1186_s20, 1  ;;  %p1187_p5 = scmp.ge.s32.totalorder %s1569_s18, 1 }
   0x9   : > { %p1643_p4 = por %p1924_p1, %p41_p0  ;;  %p141_p7 = scmp.lt.s32.totalorder %s1569_s18, 3 }
   0xa   : > { %p1648_p6 = por %p134_p3, %p41_p0  ;;  %s1571_s24 = smov [#allocation5]  }
   0xb   : > { %s1927_s21 = scalar_select %p1643_p4, 1, 0 }
   0xc   : > { %s1928_s22 = scalar_select %p1648_p6, 1, 0 }
   0xd   : > { %p1653_p8 = pnand %p1187_p5, %p141_p7  ;;  %s153_s25 = sshll.u32 %s1571_s24, 4  ;;  %s1657_s25 = int_to_ptr.vmem [resolvable:$true] %s153_s25 }
   0xe   : > { %s1572_s27 = smov [#allocation7]   ;;  %s1413_s5 = scalar_lea.hbm %s1920_s1, 512 }
   0xf   : > { %p1329_p9 = pneg %p1653_p8  ;;  %s166_s28 = sshll.u32 %s1572_s27, 4  ;;  %s1668_s28 = int_to_ptr.vmem [resolvable:$true] %s166_s28 }
  0x10   : > { %p1414_p12 = scmp.ne.s32.totalorder %s1920_s1, %s1413_s5  ;;  %p1420_p5 = scmp.lt.u32.totalorder %s1413_s5, %s1920_s1 }
  0x11   : > { %p1664_p11 = pnand %p1329_p9, %p1924_p1 }
  0x13   : > { %p1415_p13 = pneg %p1664_p11 }
  0x15   : > { %p1416_p0 = pnand %p1415_p13, %p1414_p12 }
  0x17   : > { %p1417_p3 = pneg %p1416_p0 }
  0x19   : > { %p1422_p7 = pnand %p1420_p5, %p1417_p3 }
  0x1b   : > { %1425 = shalt.err (!%p1422_p7)
}
  0x1c   : > { %s1426_s10 = scalar_lea.vmem %s1657_s25, 512  ;;  %p1434_p2 = scmp.lt.s32.totalorder %s1657_s25, %s1657_s25 }
  0x1d   : > { %p1427_p9 = scmp.ne.s32.totalorder %s1657_s25, %s1426_s10  ;;  %p1435_p12 = scmp.lt.s32.totalorder %s1426_s10, %s1426_s10 }
  0x1f   : > { %p1429_p10 = pnand %p1427_p9, %p1415_p13  ;;  %p1436_p0 = por %p1435_p12, %p1434_p2 }
  0x21   : > { %p1430_p1 = pneg %p1429_p10 }
  0x23   : > { %p1437_p6 = pnand %p1436_p0, %p1430_p1 }
  0x25   : > { %1440 = shalt.err (!%p1437_p6)
}
  0x26   : > { %s1573_s11 = smov 128   ;;  %s1574_s12 = smov 8  }
  0x27   : > { %1332 = dma.hbm_to_vmem [thread:$0]  (!%p1664_p11), %s1920_s1, 512, %s1657_s25, [#allocation6], %s1573_s11, %s1573_s11, %s1574_s12  }
  0x28   : > { %s1441_s27 = scalar_lea.hbm %s1921_s2, 512 }
  0x29   : > { %p1442_p2 = scmp.ne.s32.totalorder %s1921_s2, %s1441_s27  ;;  %p1448_p10 = scmp.lt.u32.totalorder %s1441_s27, %s1921_s2 }
  0x2b   : > { %p1444_p1 = pnand %p1442_p2, %p1415_p13 }
  0x2d   : > { %p1445_p6 = pneg %p1444_p1 }
  0x2f   : > { %p1450_p3 = pnand %p1448_p10, %p1445_p6 }
  0x31   : > { %1453 = shalt.err (!%p1450_p3)
}
  0x32   : > { %s1454_s25 = scalar_lea.vmem %s1668_s28, 512  ;;  %p1462_p12 = scmp.lt.s32.totalorder %s1668_s28, %s1668_s28 }
  0x33   : > { %p1455_p5 = scmp.ne.s32.totalorder %s1668_s28, %s1454_s25  ;;  %p1463_p0 = scmp.lt.s32.totalorder %s1454_s25, %s1454_s25 }
  0x35   : > { %p1457_p7 = pnand %p1455_p5, %p1415_p13  ;;  %p1464_p2 = por %p1463_p0, %p1462_p12 }
  0x37   : > { %p1458_p9 = pneg %p1457_p7 }
  0x39   : > { %p1465_p1 = pnand %p1464_p2, %p1458_p9 }
  0x3b   : > { %1468 = shalt.err (!%p1465_p1)
}
  0x3c   : > { %1335 = dma.hbm_to_vmem [thread:$0]  (!%p1664_p11), %s1921_s2, 512, %s1668_s28, [#allocation6], %s1573_s11, %s1573_s11, %s1574_s12  }
  0x3d   : > { %s1723_s9 = sadd.s32 1, %s1569_s18   ;;  %s28_s26 = sadd.s32 1, %s1565_s17 }
  0x3e   : > { %s25_s10 = ssub.s32 %s1569_s18, %s1723_s9  ;;  %p35_p13 = scmp.ne.s32.totalorder %s1565_s17, %s1561_s16 }
  0x3f   : > { %p26_p6 = scmp.eq.s32.totalorder %s25_s10, 0  ;;  %p36_p10 = scmp.eq.s32.totalorder %s1569_s18, 0 }
  0x40   : > { %p1931_p3 = scmp.eq.s32.totalorder %s1634_s19, 1  ;;  %p1346_p7 = scmp.lt.s32.totalorder %s1569_s18, 2 }
  0x41   : > { %s1739_s14 = scalar_select %p26_p6, %s1565_s17, %s28_s26  }
  0x42   : > { %p1733_p5 = por %p1931_p3, %p35_p13  ;;  %p37_p9 = por %p36_p10, %p35_p13 }
  0x43   : > { %s183_s20 = sand.u32 1, %s1565_s17   ;;  %s1192_s28 = sshll.u32 %s1569_s18, 7 }
  0x44   : > { %s1932_s13 = scalar_select %p1733_p5, 1, 0 }
  0x45   : > { %s1191_s24 = sshll.u32 %s183_s20, 3  ;;  %s1746_s27 = scalar_lea.hbm %s1919_s0, %s1192_s28 }
  0x46   : > { %s187_s29 = scalar_lea.vmem [#allocation2], %s1191_s24  ;;  %p1750_p11 = pnand %p1346_p7, %p37_p9 }
  0x47   : > { %s194_s30 = sshll.u32 %s187_s29, 4  ;;  %s184_s6 = scalar_lea.sflag [#allocation3], %s183_s20  ;;  %s1748_s30 = int_to_ptr.vmem [resolvable:$true] %s194_s30 }
  0x48   : > { %s1469_s25 = scalar_lea.hbm %s1746_s27, 128  ;;  %p1471_p0 = pneg %p1750_p11 }
  0x49   : > { %p1470_p12 = scmp.ne.s32.totalorder %s1746_s27, %s1469_s25  ;;  %s1474_s26 = scalar_lea.hbm %s1919_s0, 256 }
  0x4a   : > { %p1475_p13 = scmp.lt.u32.totalorder %s1746_s27, %s1919_s0  ;;  %p1476_p6 = scmp.lt.u32.totalorder %s1474_s26, %s1469_s25 }
  0x4b   : > { %p1472_p2 = pnand %p1471_p0, %p1470_p12  ;;  %p1478_p3 = scmp.lt.u32.totalorder %s1469_s25, %s1746_s27 }
  0x4c   : > { %p1477_p10 = por %p1476_p6, %p1475_p13 }
  0x4d   : > { %p1473_p1 = pneg %p1472_p2 }
  0x4e   : > { %p1479_p7 = por %p1478_p3, %p1477_p10 }
  0x50   : > { %p1480_p9 = pnand %p1479_p7, %p1473_p1 }
  0x52   : > { %1483 = shalt.err (!%p1480_p9)
}
  0x53   : > { %s1484_s20 = scalar_lea.vmem %s1748_s30, 128  ;;  %s1575_s28 = smov [#allocation2]  }
  0x54   : > { %p1485_p12 = scmp.ne.s32.totalorder %s1748_s30, %s1484_s20  ;;  %s1489_s11 = sshll.u32 %s1575_s28, 4  ;;  %s1490_s11 = int_to_ptr.vmem [resolvable:$false] %s1489_s11 }
  0x55   : > { %s1491_s12 = scalar_lea.vmem %s1490_s11, 256  ;;  %p1492_p4 = scmp.lt.s32.totalorder %s1748_s30, %s1490_s11 }
  0x56   : > { %p1487_p2 = pnand %p1485_p12, %p1471_p0  ;;  %p1493_p13 = scmp.lt.s32.totalorder %s1491_s12, %s1484_s20 }
  0x58   : > { %p1488_p5 = pneg %p1487_p2  ;;  %p1494_p6 = por %p1493_p13, %p1492_p4 }
  0x5a   : > { %p1495_p10 = pnand %p1494_p6, %p1488_p5 }
  0x5c   : > { %1498 = shalt.err (!%p1495_p10)
}
  0x5d   : > { %1339 = dma.hbm_to_vmem [thread:$0]  (!%p1750_p11), %s1746_s27, 128, %s1748_s30, %s184_s6  }
  0x5e   : > { %203 = sbr.rel (%p1653_p8) target bundleno = 1651 (0x673), region = 36  ;;  %s1782_s29 = sand.u32 (!%p1653_p8), 1, %s1561_s16  }
  0x5f   : > { %s1194_s25 = sshll.u32 (!%p1653_p8), %s1782_s29, 3  ;;  %s206_s7 = scalar_lea.sflag (!%p1653_p8), [#allocation3], %s1782_s29 }
  0x60   : > { %s209_s8 = scalar_lea.vmem (!%p1653_p8), [#allocation2], %s1194_s25  ;;  %p1934_p4 = scmp.ne.s32.totalorder (!%p1653_p8), %s1927_s21, 0 }
  0x65   : > { %1544 = dma.done.wait (%p1934_p4), %s206_s7, 128  }
  0x66   : > { %1546 = vsyncadd (%p1934_p4), %s206_s7, 4294967168  ;;  %p1935_p5 = scmp.eq.s32.totalorder %s1634_s19, 0 }
  0x68   : > { %1548 = dma.done.wait (%p1935_p5), [#allocation6], 1024   ;;  %p1936_p8 = pmov %p1935_p5 }
  0x69   : > { %v1576_v0 = vmov 0.0|0.0   ;;  %vm1577_vm0 = vmmov 0   ;;  %v1578_v1 = vmov 0.0   ;;  %v243_v2 = vld [vmem:[#allocation5] sm:$0xff]  ;;  %v244_v3 = vld [vmem:[#allocation5 + $0x8] sm:$0xff]  ;;  %v245_v4 = vld [vmem:[#allocation5 + $0x10] sm:$0xff] }
  0x6a   : > { %1550 = vsyncadd (%p1936_p8), [#allocation6], 4294966272  ;;  %1305 = vmatprep.subr.bf16.mxu0 %v1576_v0  ;;  %1251 = vmatprep.mubr.msk.f32.mxu0 %vm1577_vm0, %v1578_v1  ;;  %v1306_v5 = vpack.c.bf16 %v244_v3, %v243_v2  ;;  %v246_v6 = vld [vmem:[#allocation5 + $0x18] sm:$0xff]  ;;  %vm247_vm1 = vcmask 261120   ;;  %s1579_s21 = smov 104   ;;  %s1580_s23 = smov 120  }
  0x6b   : > { %1254 = vmatprep.subr.mxu1 %v1578_v1  ;;  %1256 = vmatprep.mubr.msk.f32.mxu1 %vm1577_vm0, %v1578_v1  ;;  %v1309_v7 = vpack.c.bf16 %v246_v6, %v245_v4  ;;  %v242_v8 = vld [vmem:[%s209_s8] sm:$0xff]  ;;  %s1581_s27 = smov 96   ;;  %s1582_s30 = smov 112   ;;  %vm330_vm2 = vcmask 64512   ;;  %v998_v6 = vld [vmem:[#allocation7] sm:$0xff]  ;;  %vm994_vm3 = vcmask 130048  }
  0x6c   : > { %1307 = vmatpush3.bf16.msra.mxu0 %v1306_v5  ;;  %s1583_s5 = smov 64   ;;  %s1584_s6 = smov 8   ;;  %vm996_vm4 = vcmask 195584  }
  0x6d   : > { %1308 = vmatprep.subr.bf16.mxu0 %v1576_v0  ;;  %s1585_s26 = smov 16   ;;  %s1586_s10 = smov 24  }
  0x6e   : > { %s1214_s28 = sshll.u32 %s1634_s19, 7  ;;  %s241_s11 = scalar_lea.vmem [#allocation8], %s1194_s25 }
  0x6f   : > { %s1097_s12 = sshll.u32 %s241_s11, 4  ;;  %p1937_p0 = scmp.ne.s32.totalorder %s1932_s13, 0  ;;  %s1876_s12 = int_to_ptr.vmem [resolvable:$true] %s1097_s12 }
  0x70   : > { %1310 = vmatpush3.bf16.msra.mxu0 %v1309_v7  ;;  %v999_v7 = vld [vmem:[#allocation7 + $0x8] sm:$0xff]  ;;  %s1499_s19 = scalar_lea.vmem %s1876_s12, 128  ;;  %s1587_s25 = smov [#allocation8]  }
  0x71   : > { %1274 = vmatprep.subr.mxu0 %v1578_v1  ;;  %p1500_p11 = scmp.ne.s32.totalorder %s1876_s12, %s1499_s19 }
  0x73   : > { %1252 = vmatmul.mubr.msk.f32.vlgmr.msra.gmra.mrb[0].mxu0 %vm247_vm1, %v242_v8  ;;  %v1312_v8 = vpack.c.bf16 %v999_v7, %v998_v6  ;;  %p1501_p1 = pnand %p1500_p11, %p1937_p0 }
  0x74   : > { %1276 = vmatprep.mubr.msk.f32.mxu0 %vm1577_vm0, %v1578_v1 }
  0x75   : > { %p1502_p3 = pneg %p1501_p1 }
 0x146   : > { %v317_v9 = vpop.f32.mrb[0].mxu0 }
 0x147   : > { %326 = vrot.lane.b32.xlu1 %v317_v9, %s1579_s21  ;;  %322 = vrot.lane.b32.xlu0 %v317_v9, %s1580_s23  ;;  %v1253_v10 = vpop.f32.mrb[1].mxu0  ;;  %s1874_s21 = scalar_lea.hbm %s1923_s4, %s1214_s28  ;;  %s1084_s23 = scalar_lea.sflag [#allocation4], %s1782_s29 }
 0x148   : > { %v1001_v10 = vld [vmem:[#allocation7 + $0x18] sm:$0xff] }
 0x14b   : > { %328 = vrot.lane.b32.xlu1 %v317_v9, %s1581_s27  ;;  %324 = vrot.lane.b32.xlu0 %v317_v9, %s1582_s30 }
 0x1b9   : > { %v1807_v11 = vpop.permute.xlu1 %326  ;;  %v323_v12 = vpop.permute.xlu0 %322 }
 0x1ba   : > { %405 = vrot.lane.b32.xlu0 %v323_v12, %s1581_s27 }
 0x1bd   : > { %v329_v13 = vpop.permute.xlu1 %328  ;;  %v1809_v14 = vpop.permute.xlu0 %324 }
 0x1be   : > { %1255 = vmatpush3.xpose.msk.msra.mxu1 %vm330_vm2, %v329_v13  ;;  %557 = vrot.lane.b32.xlu0 %v1807_v11, %s1581_s27 }
 0x1bf   : > { %481 = vrot.lane.b32.xlu1 %v1809_v14, %s1581_s27  ;;  %1259 = vmatprep.subr.mxu1 %v1578_v1  ;;  %s1503_s27 = sshll.u32 %s1587_s25, 4  ;;  %s1504_s27 = int_to_ptr.vmem [resolvable:$false] %s1503_s27 }
 0x1c0   : > { %s1505_s30 = scalar_lea.vmem %s1504_s27, 256  ;;  %p1506_p7 = scmp.lt.s32.totalorder %s1876_s12, %s1504_s27 }
 0x1c1   : > { %1257 = vmatmul.mubr.msk.f32.vlgmr.msra.gmra.mrb[0].mxu1 %vm330_vm2, %v317_v9  ;;  %p1507_p9 = scmp.lt.s32.totalorder %s1505_s30, %s1499_s19 }
 0x1c2   : > { %1261 = vmatprep.mubr.msk.f32.mxu1 %vm1577_vm0, %v1578_v1 }
 0x1c3   : > { %p1508_p12 = por %p1507_p9, %p1506_p7 }
 0x1c5   : > { %p1509_p2 = pnand %p1508_p12, %p1502_p3 }
 0x22c   : > { %v406_v15 = vpop.permute.xlu0 %405 }
 0x22d   : > { %1260 = vmatpush3.xpose.msk.msra.mxu1 %vm330_vm2, %v406_v15 }
 0x22e   : > { %1264 = vmatprep.subr.mxu1 %v1578_v1 }
 0x230   : > { %1262 = vmatmul.mubr.msk.f32.vlgmr.msra.gmra.mrb[2].mxu1 %vm330_vm2, %v323_v12  ;;  %v558_v17 = vpop.permute.xlu0 %557 }
 0x231   : > { %v482_v16 = vpop.permute.xlu1 %481  ;;  %1266 = vmatprep.mubr.msk.f32.mxu1 %vm1577_vm0, %v1578_v1 }
 0x232   : > { %1265 = vmatpush3.xpose.msk.msra.mxu1 %vm330_vm2, %v482_v16 }
 0x233   : > { %1269 = vmatprep.subr.mxu1 %v1578_v1 }
 0x235   : > { %1267 = vmatmul.mubr.msk.f32.vlgmr.msra.gmra.mrb[4].mxu1 %vm330_vm2, %v1809_v14 }
 0x236   : > { %1270 = vmatpush3.xpose.msk.msra.mxu1 %vm330_vm2, %v558_v17  ;;  %1271 = vmatprep.mubr.msk.f32.mxu1 %vm1577_vm0, %v1578_v1 }
 0x237   : > { %1279 = vmatprep.subr.mxu1 %v1578_v1 }
 0x239   : > { %1272 = vmatmul.mubr.msk.f32.vlgmr.msra.gmra.mrb[6].mxu1 %vm330_vm2, %v1807_v11 }
 0x23a   : > { %1281 = vmatprep.mubr.msk.f32.mxu1 %vm1577_vm0, %v1578_v1 }
 0x294   : > { %v401_v18 = vpop.f32.mrb[0].mxu1 }
 0x295   : > { %v1258_v19 = vpop.f32.mrb[1].mxu1  ;;  %v633_v20 = vsel %vm330_vm2, %v401_v18, -inf }
 0x296   : > { %634 = vmax.xlane.f32.xlu1 %v633_v20 }
 0x303   : > { %v477_v21 = vpop.f32.mrb[2].mxu1 }
 0x304   : > { %v1263_v22 = vpop.f32.mrb[3].mxu1  ;;  %v636_v23 = vsel %vm330_vm2, %v477_v21, -inf }
 0x305   : > { %637 = vmax.xlane.f32.xlu0 %v636_v23  ;;  %v1211_v22 = vld [vmem:[%s1922_s3] ss:$0 sm:$0xff] }
 0x308   : > { %v553_v24 = vpop.f32.mrb[4].mxu1 }
 0x309   : > { %v1268_v25 = vpop.f32.mrb[5].mxu1  ;;  %v639_v26 = vsel %vm330_vm2, %v553_v24, -inf }
 0x30a   : > { %640 = vmax.xlane.f32.xlu0 %v639_v26 }
 0x30c   : > { %v629_v27 = vpop.f32.mrb[6].mxu1 }
 0x30d   : > { %v1273_v28 = vpop.f32.mrb[7].mxu1  ;;  %v642_v29 = vsel %vm330_vm2, %v629_v27, -inf }
 0x30e   : > { %643 = vmax.xlane.f32.xlu1 %v642_v29 }
 0x31f   : > { %753 = vrot.lane.b32.xlu1 %v323_v12, %s1583_s5 }
 0x320   : > { %677 = vrot.lane.b32.xlu0 %v317_v9, %s1583_s5  ;;  %v1000_v9 = vld [vmem:[#allocation7 + $0x10] sm:$0xff] }
 0x323   : > { %v635_v30 = vpop.xlane.xlu1 %634 }
 0x324   : > { %v645_v31 = vsub.f32 %v401_v18, %v635_v30 }
 0x326   : > { %v649_v32 = vmul.f32 1.442695, %v645_v31 }
 0x328   : > { %1397 = vpow2.f32 %v649_v32 }
 0x332   : > { %v1398_v33 = vpop.eup %1397 }
 0x333   : > { %v657_v34 = vsel %vm330_vm2, %v1398_v33, 0.0 }
 0x33f   : > { %658 = vadd.xlane.f32.xlu0 %v657_v34 }
 0x392   : > { %v638_v35 = vpop.xlane.xlu0 %637 }
 0x393   : > { %v646_v36 = vsub.f32 %v477_v21, %v638_v35 }
 0x395   : > { %v651_v37 = vmul.f32 1.442695, %v646_v36 }
 0x397   : > { %1399 = vpow2.f32 %v651_v37  ;;  %v641_v38 = vpop.xlane.xlu0 %640 }
 0x398   : > { %v647_v39 = vsub.f32 %v553_v24, %v641_v38 }
 0x39a   : > { %v653_v40 = vmul.f32 1.442695, %v647_v39 }
 0x39b   : > { %v644_v41 = vpop.xlane.xlu1 %643  ;;  %v678_v42 = vpop.permute.xlu0 %677 }
 0x39c   : > { %1401 = vpow2.f32 %v653_v40  ;;  %v648_v43 = vsub.f32 %v629_v27, %v644_v41  ;;  %1275 = vmatpush3.msra.mxu0 %v678_v42 }
 0x39d   : > { %1284 = vmatprep.subr.mxu0 %v1578_v1 }
 0x39e   : > { %v655_v44 = vmul.f32 1.442695, %v648_v43 }
 0x39f   : > { %v754_v45 = vpop.permute.xlu1 %753 }
 0x3a0   : > { %1403 = vpow2.f32 %v655_v44  ;;  %1280 = vmatpush3.msra.mxu1 %v754_v45 }
 0x3a1   : > { %v1400_v46 = vpop.eup %1399  ;;  %1289 = vmatprep.subr.mxu1 %v1578_v1 }
 0x3a2   : > { %v660_v47 = vsel %vm330_vm2, %v1400_v46, 0.0 }
 0x3a3   : > { %661 = vadd.xlane.f32.xlu1 %v660_v47 }
 0x3a6   : > { %v1402_v48 = vpop.eup %1401 }
 0x3a7   : > { %v663_v49 = vsel %vm330_vm2, %v1402_v48, 0.0 }
 0x3a8   : > { %664 = vadd.xlane.f32.xlu0 %v663_v49 }
 0x3aa   : > { %v1404_v50 = vpop.eup %1403 }
 0x3ab   : > { %v666_v51 = vsel %vm330_vm2, %v1404_v50, 0.0 }
 0x3ac   : > { %667 = vadd.xlane.f32.xlu1 %v666_v51 }
 0x3bd   : > { %829 = vrot.lane.b32.xlu1 %v1809_v14, %s1583_s5 }
 0x3be   : > { %905 = vrot.lane.b32.xlu0 %v1807_v11, %s1583_s5  ;;  %v1315_v11 = vpack.c.bf16 %v1001_v10, %v1000_v9 }
 0x3cc   : > { %v659_v52 = vpop.xlane.xlu0 %658 }
 0x3cd   : > { %1405 = vrcp.f32 %v659_v52 }
 0x3d7   : > { %v1406_v53 = vpop.eup %1405 }
 0x3d8   : > { %v673_v54 = vmul.f32 %v1406_v53, %v1398_v33 }
 0x3da   : > { %1277 = vmatmul.mubr.msk.f32.vlgmr.msra.gmra.mrb[2].mxu0 %vm330_vm2, %v673_v54 }
 0x3db   : > { %1286 = vmatprep.mubr.msk.f32.mxu0 %vm1577_vm0, %v1578_v1 }
 0x430   : > { %v662_v55 = vpop.xlane.xlu1 %661 }
 0x431   : > { %1407 = vrcp.f32 %v662_v55 }
 0x435   : > { %v665_v56 = vpop.xlane.xlu0 %664 }
 0x436   : > { %1409 = vrcp.f32 %v665_v56 }
 0x439   : > { %v668_v57 = vpop.xlane.xlu1 %667  ;;  %v906_v61 = vpop.permute.xlu0 %905 }
 0x43a   : > { %1411 = vrcp.f32 %v668_v57 }
 0x43b   : > { %v1408_v58 = vpop.eup %1407 }
 0x43c   : > { %v674_v59 = vmul.f32 %v1408_v58, %v1400_v46 }
 0x43d   : > { %v830_v60 = vpop.permute.xlu1 %829 }
 0x43e   : > { %1285 = vmatpush3.msra.mxu0 %v830_v60  ;;  %1282 = vmatmul.mubr.msk.f32.vlgmr.msra.gmra.mrb[8].mxu1 %vm330_vm2, %v674_v59 }
 0x43f   : > { %1290 = vmatpush3.msra.mxu1 %v906_v61  ;;  %1291 = vmatprep.mubr.msk.f32.mxu1 %vm1577_vm0, %v1578_v1 }
 0x440   : > { %v1410_v62 = vpop.eup %1409  ;;  %1311 = vmatprep.subr.bf16.mxu0 %v1576_v0 }
 0x441   : > { %v675_v63 = vmul.f32 %v1410_v62, %v1402_v48 }
 0x443   : > { %1287 = vmatmul.mubr.msk.f32.vlgmr.msra.gmra.mrb[4].mxu0 %vm330_vm2, %v675_v63 }
 0x444   : > { %v1412_v2 = vpop.eup %1411  ;;  %1302 = vmatprep.mubr.msk.f32.mxu0 %vm1577_vm0, %v1578_v1  ;;  %1313 = vmatpush3.bf16.msra.mxu0 %v1312_v8 }
 0x445   : > { %v676_v3 = vmul.f32 %v1412_v2, %v1404_v50  ;;  %1314 = vmatprep.subr.bf16.mxu0 %v1576_v0 }
 0x447   : > { %1292 = vmatmul.mubr.msk.f32.vlgmr.msra.gmra.mrb[10].mxu1 %vm330_vm2, %v676_v3 }
 0x448   : > { %1316 = vmatpush3.bf16.msra.mxu0 %v1315_v11 }
 0x4ad   : > { %v749_v4 = vpop.f32.mrb[2].mxu0 }
 0x4ae   : > { %v1278_v5 = vpop.f32.mrb[3].mxu0 }
 0x511   : > { %v825_v12 = vpop.f32.mrb[8].mxu1 }
 0x512   : > { %982 = vrot.lane.b32.xlu1 %v825_v12, %s1584_s6  ;;  %v1283_v13 = vpop.f32.mrb[9].mxu1 }
 0x516   : > { %v901_v1 = vpop.f32.mrb[4].mxu0 }
 0x517   : > { %986 = vrot.lane.b32.xlu0 %v901_v1, %s1585_s26  ;;  %v1288_v14 = vpop.f32.mrb[5].mxu0 }
 0x51a   : > { %v977_v15 = vpop.f32.mrb[10].mxu1 }
 0x51b   : > { %990 = vrot.lane.b32.xlu1 %v977_v15, %s1586_s10  ;;  %v1293_v16 = vpop.f32.mrb[11].mxu1 }
 0x584   : > { %v983_v17 = vpop.permute.xlu1 %982 }
 0x585   : > { %v993_v18 = vsel %vm330_vm2, %v749_v4, %v983_v17 }
 0x589   : > { %v987_v0 = vpop.permute.xlu0 %986 }
 0x58a   : > { %v995_v19 = vsel %vm994_vm3, %v993_v18, %v987_v0 }
 0x58d   : > { %v991_v20 = vpop.permute.xlu1 %990 }
 0x58e   : > { %v997_v21 = vsel %vm996_vm4, %v995_v19, %v991_v20 }
 0x58f   : > { %1303 = vmatmul.mubr.msk.f32.vlgmr.msra.gmra.mrb[6].mxu0 %vm247_vm1, %v997_v21 }
 0x662   : > { %v1078_v23 = vpop.f32.mrb[6].mxu0 }
 0x663   : > { %v1079_v24 = vadd.f32 %v1211_v22, %v1078_v23  ;;  %v1304_v25 = vpop.f32.mrb[7].mxu0 }
 0x665   : > { %1082 = vst.msk [vmem:[%s241_s11] sm:$0xff] %vm247_vm1, %v1079_v24 }
 0x666   : > { %1512 = shalt.err (!%p1509_p2)
}
 0x667   : > { %s1513_s29 = scalar_lea.hbm %s1874_s21, 128  ;;  %s1517_s26 = scalar_lea.hbm %s1923_s4, 256 }
 0x668   : > { %p1514_p13 = scmp.ne.s32.totalorder %s1874_s21, %s1513_s29  ;;  %p1518_p4 = scmp.lt.u32.totalorder %s1874_s21, %s1923_s4 }
 0x669   : > { %p1519_p5 = scmp.lt.u32.totalorder %s1517_s26, %s1513_s29  ;;  %p1521_p11 = scmp.lt.u32.totalorder %s1513_s29, %s1874_s21 }
 0x66a   : > { %p1515_p6 = pnand %p1514_p13, %p1937_p0 }
 0x66b   : > { %p1520_p8 = por %p1519_p5, %p1518_p4 }
 0x66c   : > { %p1516_p10 = pneg %p1515_p6 }
 0x66d   : > { %p1522_p1 = por %p1521_p11, %p1520_p8 }
 0x66f   : > { %p1523_p3 = pnand %p1522_p1, %p1516_p10 }
 0x671   : > { %1526 = shalt.err (!%p1523_p3)
}
 0x672   : > { %1327 = dma.vmem_to_hbm [thread:$0]  (%p1937_p0), %s1876_s12, 128, %s1874_s21, %s1084_s23  }
 0x673 PF: > { %s1109_s20 = sand.u32 1, %s1557_s15   ;;  %p1938_p7 = scmp.ne.s32.totalorder %s1928_s22, 0 }
 0x674   : > { %p1939_p9 = scmp.ge.s32.totalorder %s1569_s18, 2  ;;  %s1110_s28 = scalar_lea.sflag [#allocation4], %s1109_s20 }
 0x676   : > { %p1341_p12 = pnand %p1939_p9, %p1938_p7 }
 0x678   : > { %1552 = dma.done.wait (!%p1341_p12), %s1110_s28, 128  }
 0x679   : > { %1554 = vsyncadd (!%p1341_p12), %s1110_s28, 4294967168  ;;  %p18_p2 = scmp.ge.s32.totalorder %s1723_s9, 4   ;;  %s1940_s15 = smov %s1561_s16 }
 0x67a   : > { %s1941_s16 = smov %s1565_s17  ;;  %s1942_s17 = smov %s1739_s14 }
 0x67b   : > { %s1943_s18 = smov %s1723_s9  ;;  %20 = sbr.rel (!%p18_p2) target bundleno = 6 (0x6), region = 89 }
 0x682   :  { %1115 = vsyncpa [#allocation3], 1 }
 0x683   :  { %1117 = vsyncpa [#allocation3 + $0x1], 1 }
 0x684   :  { %1118 = vsyncpa [#allocation6], 1 }
 0x685   :  { %1119 = vsyncpa [#allocation4], 1 }
 0x686   :  { %1121 = vsyncpa [#allocation4 + $0x1], 1 }

</bundles_post_ra>
